<compile_context>
chip_gen: v5e
topology: v5e:2x2
jax: 0.10.0
libtpu: 0.0.40
codegen_flags: <defaults>
</compile_context>

<pallas_src>
import functools

import jax
import jax.numpy as jnp
import numpy as np
from jax import lax
from jax.experimental import pallas as pl
from jax.experimental.pallas import tpu as pltpu

LAMBDA_COORD = 8.0
LAMBDA_NOOBJ = 1.0
LAMBDA_CLASS = 0.7
_EPS = 1e-10

_LANES = 128
_SUBLANES = 8
_COLS_PER_VREG = _LANES * _SUBLANES  # 1024


# ----------------------------------------------------------------------------
# Pallas kernel
# ----------------------------------------------------------------------------
def _yolo_loss_kernel(out_ref, gt_ref, loss_ref, acc_ref, *, inv_num_sample, bt):
    """out_ref / gt_ref: (14, bt, 128) channels-major block.
    loss_ref: (1, 1) output.  acc_ref: (8, 128) VMEM accumulator, resident
    across grid steps (output block index is constant -> 'arbitrary' axis)."""
    i = pl.program_id(0)

    @pl.when(i == 0)
    def _():
        acc_ref[...] = jnp.zeros_like(acc_ref)

    nchunks = bt // _SUBLANES

    def chunk(k, acc):
        base = pl.multiple_of(k * _SUBLANES, _SUBLANES)
        sl = pl.ds(base, _SUBLANES)

        def och(c):  # one channel, one chunk: dense (8, 128) == exactly 1 vreg
            return out_ref[c, sl, :].astype(jnp.float32)

        def gch(c):
            return gt_ref[c, sl, :].astype(jnp.float32)

        o0, o1, o2, o3, o4 = (och(c) for c in range(5))
        o5, o6, o7, o8, o9 = (och(c) for c in range(5, 10))
        g0, g1, g2, g3, g4 = (gch(c) for c in range(5))
        g5, g6, g7, g8, g9 = (gch(c) for c in range(5, 10))

        obj = (g4 > 0.0).astype(jnp.float32)
        noobj = (g4 == 0.0).astype(jnp.float32)

        # ---- confidence diffs (no-object loss and "other box" loss) ----
        d4 = o4 - g4
        d9 = o9 - g9
        d4sq = d4 * d4
        d9sq = d9 * d9

        # ---- ground-truth box (channels 0..3), shared by both IoUs ----
        # TODO(synk): util.IoU is not provided by the reference; standard
        # center-format IoU with w = sqrt(w)^2, h = sqrt(h)^2 is assumed.
        gw = g2 * g2
        gh = g3 * g3
        g_l = g0 - 0.5 * gw
        g_r = g0 + 0.5 * gw
        g_t = g1 - 0.5 * gh
        g_b = g1 + 0.5 * gh
        g_area = gw * gh

        def iou(px, py, psw, psh):
            pw = psw * psw
            ph = psh * psh
            l = jnp.maximum(px - 0.5 * pw, g_l)
            r = jnp.minimum(px + 0.5 * pw, g_r)
            t = jnp.maximum(py - 0.5 * ph, g_t)
            b = jnp.minimum(py + 0.5 * ph, g_b)
            inter = jnp.maximum(r - l, 0.0) * jnp.maximum(b - t, 0.0)
            union = pw * ph + g_area - inter
            # approx=True would push this onto the EUP but its ~2^-12 relative
            # error is borderline vs. the 1e-4 test tolerance -> keep refined.
            return inter * pl.reciprocal(jnp.maximum(union, _EPS), approx=False)

        iou_a = iou(o0, o1, o2, o3)
        iou_b = iou(o5, o6, o7, o8)
        sel_a = iou_a >= iou_b          # first box responsible (matches i1 >= i2)
        max_iou = jnp.maximum(iou_a, iou_b)

        # ---- responsible-box confidence loss (target = max IoU) ----
        conf_da = o4 - max_iou
        conf_db = o9 - max_iou
        conf_term = jnp.where(sel_a, conf_da * conf_da, conf_db * conf_db)

        # ---- localisation loss (x, y, sqrt(w), sqrt(h)) of responsible box ----
        loc_a = (o0 - g0) ** 2 + (o1 - g1) ** 2 + (o2 - g2) ** 2 + (o3 - g3) ** 2
        loc_b = (o5 - g5) ** 2 + (o6 - g6) ** 2 + (o7 - g7) ** 2 + (o8 - g8) ** 2
        loc_term = jnp.where(sel_a, loc_a, loc_b)

        # ---- non-responsible box confidence loss ----
        nb_term = jnp.where(sel_a, d9sq, d4sq)

        # ---- class loss ----
        cls_term = ((och(10) - gch(10)) ** 2 + (och(11) - gch(11)) ** 2 +
                    (och(12) - gch(12)) ** 2 + (och(13) - gch(13)) ** 2)

        term = (LAMBDA_NOOBJ * noobj * (d4sq + d9sq)
                + obj * (conf_term
                         + LAMBDA_COORD * loc_term
                         + LAMBDA_NOOBJ * nb_term
                         + LAMBDA_CLASS * cls_term))
        return acc + term

    partial = lax.fori_loop(0, nchunks, chunk,
                            jnp.zeros((_SUBLANES, _LANES), jnp.float32))
    acc_ref[...] += partial

    @pl.when(i == pl.num_programs(0) - 1)
    def _():
        total = jnp.sum(acc_ref[...]) * inv_num_sample
        loss_ref[...] = jnp.reshape(total, (1, 1))


# ----------------------------------------------------------------------------
# Wrapper
# ----------------------------------------------------------------------------
def yolo_loss(output, ground_truth, *, max_block_cols=49152):
    """output, ground_truth: (N, 6, 8, 14).  Returns scalar loss.

    max_block_cols caps the per-grid-step column count; the default (49152)
    keeps the double-buffered input footprint (~11 MiB) under the default
    scoped-VMEM limit of every TPU generation (v5e 16 MiB, v6e/v7x 32 MiB)."""
    N, H, W, C = output.shape
    assert C == 14
    R = N * H * W
    cdiv = lambda a, b: -(-a // b)

    # Row-blocks of 128 lanes; bt (sublane-block count per step) must be a
    # multiple of 8 so every chunk is a full (8, 128) vreg.
    bt_cap = max(_SUBLANES, (max_block_cols // _COLS_PER_VREG) * _SUBLANES)
    bt_single = cdiv(R, _COLS_PER_VREG) * _SUBLANES
    if bt_single <= bt_cap:          # whole problem in ONE grid step
        bt, num_tiles = bt_single, 1
    else:
        bt = bt_cap
        num_tiles = cdiv(cdiv(R, _LANES), bt)
    R_pad = num_tiles * bt * _LANES

    # Cast + pad + transpose: left to XLA to fuse into a single HBM pass.
    # Zero padding is loss-neutral (gt_conf == 0 and pred == gt == 0).
    out2d = output.reshape(R, C).astype(jnp.float32)
    gt2d = ground_truth.reshape(R, C).astype(jnp.float32)
    if R_pad != R:
        out2d = jnp.pad(out2d, ((0, R_pad - R), (0, 0)))
        gt2d = jnp.pad(gt2d, ((0, R_pad - R), (0, 0)))
    out_cm = jnp.transpose(out2d, (1, 0)).reshape(C, R_pad // _LANES, _LANES)
    gt_cm = jnp.transpose(gt2d, (1, 0)).reshape(C, R_pad // _LANES, _LANES)

    kernel = functools.partial(_yolo_loss_kernel,
                               inv_num_sample=1.0 / float(N), bt=bt)

    loss = pl.pallas_call(
        kernel,
        out_shape=jax.ShapeDtypeStruct((1, 1), jnp.float32),
        grid_spec=pltpu.PrefetchScalarGridSpec(
            num_scalar_prefetch=0,
            grid=(num_tiles,),
            in_specs=[
                pl.BlockSpec((C, bt, _LANES), lambda i: (0, i, 0)),
                pl.BlockSpec((C, bt, _LANES), lambda i: (0, i, 0)),
            ],
            out_specs=pl.BlockSpec((1, 1), lambda i: (0, 0)),
            scratch_shapes=[pltpu.VMEM((_SUBLANES, _LANES), jnp.float32)],
        ),
        compiler_params=pltpu.CompilerParams(
            dimension_semantics=("arbitrary",),   # resident accumulator
        ),
        cost_estimate=pl.CostEstimate(
            flops=130 * R_pad,
            transcendentals=2 * R_pad,
            bytes_accessed=2 * C * R_pad * 4 + 4,
        ),
    )(out_cm, gt_cm)
    return loss[0, 0]


# ----------------------------------------------------------------------------
# Pure numpy reference (mirrors the PyTorch loop-based implementation)
# ----------------------------------------------------------------------------
def _iou_np(b1, b2):
    w1, h1 = b1[2] ** 2, b1[3] ** 2
    w2, h2 = b2[2] ** 2, b2[3] ** 2
    left = max(b1[0] - 0.5 * w1, b2[0] - 0.5 * w2)
    right = min(b1[0] + 0.5 * w1, b2[0] + 0.5 * w2)
    top = max(b1[1] - 0.5 * h1, b2[1] - 0.5 * h2)
    bot = min(b1[1] + 0.5 * h1, b2[1] + 0.5 * h2)
    inter = max(right - left, 0.0) * max(bot - top, 0.0)
    union = w1 * h1 + w2 * h2 - inter
    return inter / max(union, _EPS)


def reference_loss(output, ground_truth):
    output = np.asarray(output, np.float32)
    gt = np.asarray(ground_truth, np.float32)
    N = output.shape[0]
    out_f = output.reshape(-1, 14)
    gt_f = gt.reshape(-1, 14)

    co = gt_f[:, 4] > 0
    no = gt_f[:, 4] == 0

    co_pred = out_f[co]
    co_gt = gt_f[co]
    out_box = co_pred[:, :10].reshape(-1, 5)
    gt_box = co_gt[:, :10].reshape(-1, 5)
    out_class = co_pred[:, 10:]
    gt_class = co_gt[:, 10:]

    no_out = out_f[no]
    no_gt = gt_f[no]
    no_loss = float(np.sum((no_out[:, [4, 9]] - no_gt[:, [4, 9]]) ** 2))

    conf_loss = loc_loss = no_box_conf_loss = 0.0
    for i in range(0, out_box.shape[0], 2):
        i1 = _iou_np(out_box[i], gt_box[i])
        i2 = _iou_np(out_box[i + 1], gt_box[i])
        idx = 0 if i1 >= i2 else 1
        max_iou = max(i1, i2)
        rp, rg = out_box[i + idx], gt_box[i + idx]
        op, og = out_box[i + 1 - idx], gt_box[i + 1 - idx]
        conf_loss += (rp[4] - max_iou) ** 2
        loc_loss += float(np.sum((rp[:2] - rg[:2]) ** 2) + np.sum((rp[2:4] - rg[2:4]) ** 2))
        no_box_conf_loss += (op[4] - og[4]) ** 2

    class_loss = float(np.sum((out_class - gt_class) ** 2))

    return (LAMBDA_NOOBJ * no_loss + conf_loss + LAMBDA_COORD * loc_loss
            + LAMBDA_NOOBJ * no_box_conf_loss + LAMBDA_CLASS * class_loss) / N


# ----------------------------------------------------------------------------
if __name__ == "__main__":
    key = jax.random.PRNGKey(0)

    def make_inputs(key, N):
        k1, k2, k3 = jax.random.split(key, 3)
        H, W, C = 6, 8, 14
        out = jax.random.uniform(k1, (N, H, W, C), jnp.float32)
        gt = jax.random.uniform(k2, (N, H, W, C), jnp.float32)
        obj_mask = jax.random.bernoulli(k3, 0.3, (N, H, W)).astype(jnp.float32)
        gt = gt.at[..., 4].set(obj_mask)
        gt = gt.at[..., 9].set(obj_mask)
        return out, gt

    k_small, k_big = jax.random.split(key)

    # Small case: single grid step, single in-kernel chunk (bt = 8).
    out_s, gt_s = make_inputs(k_small, 2)
    loss_s = jax.block_until_ready(yolo_loss(out_s, gt_s))
    ref_s = reference_loss(np.asarray(out_s), np.asarray(gt_s))
    assert np.isfinite(float(loss_s))
    assert np.allclose(float(loss_s), ref_s, rtol=1e-4, atol=1e-4), (float(loss_s), ref_s)

    # Larger case: single grid step, multi-chunk fori_loop (bt = 24).
    out_b, gt_b = make_inputs(k_big, 48)   # R = 2304
    loss_b = jax.block_until_ready(yolo_loss(out_b, gt_b))
    ref_b = reference_loss(np.asarray(out_b), np.asarray(gt_b))
    assert np.isfinite(float(loss_b))
    assert np.allclose(float(loss_b), ref_b, rtol=1e-4, atol=1e-4), (float(loss_b), ref_b)

    # Same data with a small block cap: exercises the multi-step grid /
    # resident-accumulator path (3 grid steps).
    loss_m = jax.block_until_ready(yolo_loss(out_b, gt_b, max_block_cols=1024))
    assert np.isfinite(float(loss_m))
    assert np.allclose(float(loss_m), ref_b, rtol=1e-4, atol=1e-4), (float(loss_m), ref_b)

    print("KERNEL_OK")
</pallas_src>

<mosaic_0001>
module attributes {stable_mosaic.version = 11 : i64} {
  func.func @_yolo_loss_kernel(%arg0: i32, %arg1: memref<14x8x128xf32, #tpu.memory_space<vmem>>, %arg2: memref<14x8x128xf32, #tpu.memory_space<vmem>>, %arg3: memref<1x1xf32, #tpu.memory_space<vmem>>, %arg4: memref<8x128xf32, #tpu.memory_space<vmem>>) attributes {dimension_semantics = [#tpu.dimension_semantics<arbitrary>], iteration_bounds = array<i64: 1>, scalar_prefetch = 0 : i64, scratch_operands = 1 : i64, tpu.core_type = #tpu.core_type<tc>, window_params = [{transform_indices = @transform_0, window_bounds = array<i64: 14, 8, 128>}, {transform_indices = @transform_1, window_bounds = array<i64: 14, 8, 128>}, {pipeline_mode = #tpu.pipeline_mode<synchronous>, transform_indices = @transform_2, window_bounds = array<i64: 1, 1>}]} {
    %c0_i32 = arith.constant 0 : i32
    %0 = arith.cmpi eq, %arg0, %c0_i32 : i32
    %1 = arith.extui %0 : i1 to i32
    %c0_i32_0 = arith.constant 0 : i32
    %2 = arith.cmpi ne, %1, %c0_i32_0 : i32
    scf.if %2 {
      %cst_74 = arith.constant 0.000000e+00 : f32
      %245 = vector.broadcast %cst_74 : f32 to vector<8x128xf32>
      %c0_75 = arith.constant 0 : index
      %c0_76 = arith.constant 0 : index
      %246 = vector.load %arg4[%c0_75, %c0_76] : memref<8x128xf32, #tpu.memory_space<vmem>>, vector<8x128xf32>
      tpu.vector_store %arg4[%c0_75, %c0_76], %245 {strides = array<i32>} : memref<8x128xf32, #tpu.memory_space<vmem>>, vector<8x128xf32>,
    } else {
    }
    %cst = arith.constant 0.000000e+00 : f32
    %3 = vector.broadcast %cst : f32 to vector<8x128xf32>
    %c0_i32_1 = arith.constant 0 : i32
    %c8_i32 = arith.constant 8 : i32
    %4 = arith.muli %c0_i32_1, %c8_i32 : i32
    %5 = tpu.assume_multiple %4, 8 : i32
    %c0 = arith.constant 0 : index
    %6 = arith.index_cast %5 : i32 to index
    %c0_2 = arith.constant 0 : index
    %7 = vector.load %arg1[%c0, %6, %c0_2] : memref<14x8x128xf32, #tpu.memory_space<vmem>>, vector<1x8x128xf32>
    %8 = vector.shape_cast %7 : vector<1x8x128xf32> to vector<8x128xf32>
    %c1 = arith.constant 1 : index
    %9 = arith.index_cast %5 : i32 to index
    %c0_3 = arith.constant 0 : index
    %10 = vector.load %arg1[%c1, %9, %c0_3] : memref<14x8x128xf32, #tpu.memory_space<vmem>>, vector<1x8x128xf32>
    %11 = vector.shape_cast %10 : vector<1x8x128xf32> to vector<8x128xf32>
    %c2 = arith.constant 2 : index
    %12 = arith.index_cast %5 : i32 to index
    %c0_4 = arith.constant 0 : index
    %13 = vector.load %arg1[%c2, %12, %c0_4] : memref<14x8x128xf32, #tpu.memory_space<vmem>>, vector<1x8x128xf32>
    %14 = vector.shape_cast %13 : vector<1x8x128xf32> to vector<8x128xf32>
    %c3 = arith.constant 3 : index
    %15 = arith.index_cast %5 : i32 to index
    %c0_5 = arith.constant 0 : index
    %16 = vector.load %arg1[%c3, %15, %c0_5] : memref<14x8x128xf32, #tpu.memory_space<vmem>>, vector<1x8x128xf32>
    %17 = vector.shape_cast %16 : vector<1x8x128xf32> to vector<8x128xf32>
    %c4 = arith.constant 4 : index
    %18 = arith.index_cast %5 : i32 to index
    %c0_6 = arith.constant 0 : index
    %19 = vector.load %arg1[%c4, %18, %c0_6] : memref<14x8x128xf32, #tpu.memory_space<vmem>>, vector<1x8x128xf32>
    %20 = vector.shape_cast %19 : vector<1x8x128xf32> to vector<8x128xf32>
    %c5 = arith.constant 5 : index
    %21 = arith.index_cast %5 : i32 to index
    %c0_7 = arith.constant 0 : index
    %22 = vector.load %arg1[%c5, %21, %c0_7] : memref<14x8x128xf32, #tpu.memory_space<vmem>>, vector<1x8x128xf32>
    %23 = vector.shape_cast %22 : vector<1x8x128xf32> to vector<8x128xf32>
    %c6 = arith.constant 6 : index
    %24 = arith.index_cast %5 : i32 to index
    %c0_8 = arith.constant 0 : index
    %25 = vector.load %arg1[%c6, %24, %c0_8] : memref<14x8x128xf32, #tpu.memory_space<vmem>>, vector<1x8x128xf32>
    %26 = vector.shape_cast %25 : vector<1x8x128xf32> to vector<8x128xf32>
    %c7 = arith.constant 7 : index
    %27 = arith.index_cast %5 : i32 to index
    %c0_9 = arith.constant 0 : index
    %28 = vector.load %arg1[%c7, %27, %c0_9] : memref<14x8x128xf32, #tpu.memory_space<vmem>>, vector<1x8x128xf32>
    %29 = vector.shape_cast %28 : vector<1x8x128xf32> to vector<8x128xf32>
    %c8 = arith.constant 8 : index
    %30 = arith.index_cast %5 : i32 to index
    %c0_10 = arith.constant 0 : index
    %31 = vector.load %arg1[%c8, %30, %c0_10] : memref<14x8x128xf32, #tpu.memory_space<vmem>>, vector<1x8x128xf32>
    %32 = vector.shape_cast %31 : vector<1x8x128xf32> to vector<8x128xf32>
    %c9 = arith.constant 9 : index
    %33 = arith.index_cast %5 : i32 to index
    %c0_11 = arith.constant 0 : index
    %34 = vector.load %arg1[%c9, %33, %c0_11] : memref<14x8x128xf32, #tpu.memory_space<vmem>>, vector<1x8x128xf32>
    %35 = vector.shape_cast %34 : vector<1x8x128xf32> to vector<8x128xf32>
    %c0_12 = arith.constant 0 : index
    %36 = arith.index_cast %5 : i32 to index
    %c0_13 = arith.constant 0 : index
    %37 = vector.load %arg2[%c0_12, %36, %c0_13] : memref<14x8x128xf32, #tpu.memory_space<vmem>>, vector<1x8x128xf32>
    %38 = vector.shape_cast %37 : vector<1x8x128xf32> to vector<8x128xf32>
    %c1_14 = arith.constant 1 : index
    %39 = arith.index_cast %5 : i32 to index
    %c0_15 = arith.constant 0 : index
    %40 = vector.load %arg2[%c1_14, %39, %c0_15] : memref<14x8x128xf32, #tpu.memory_space<vmem>>, vector<1x8x128xf32>
    %41 = vector.shape_cast %40 : vector<1x8x128xf32> to vector<8x128xf32>
    %c2_16 = arith.constant 2 : index
    %42 = arith.index_cast %5 : i32 to index
    %c0_17 = arith.constant 0 : index
    %43 = vector.load %arg2[%c2_16, %42, %c0_17] : memref<14x8x128xf32, #tpu.memory_space<vmem>>, vector<1x8x128xf32>
    %44 = vector.shape_cast %43 : vector<1x8x128xf32> to vector<8x128xf32>
    %c3_18 = arith.constant 3 : index
    %45 = arith.index_cast %5 : i32 to index
    %c0_19 = arith.constant 0 : index
    %46 = vector.load %arg2[%c3_18, %45, %c0_19] : memref<14x8x128xf32, #tpu.memory_space<vmem>>, vector<1x8x128xf32>
    %47 = vector.shape_cast %46 : vector<1x8x128xf32> to vector<8x128xf32>
    %c4_20 = arith.constant 4 : index
    %48 = arith.index_cast %5 : i32 to index
    %c0_21 = arith.constant 0 : index
    %49 = vector.load %arg2[%c4_20, %48, %c0_21] : memref<14x8x128xf32, #tpu.memory_space<vmem>>, vector<1x8x128xf32>
    %50 = vector.shape_cast %49 : vector<1x8x128xf32> to vector<8x128xf32>
    %c5_22 = arith.constant 5 : index
    %51 = arith.index_cast %5 : i32 to index
    %c0_23 = arith.constant 0 : index
    %52 = vector.load %arg2[%c5_22, %51, %c0_23] : memref<14x8x128xf32, #tpu.memory_space<vmem>>, vector<1x8x128xf32>
    %53 = vector.shape_cast %52 : vector<1x8x128xf32> to vector<8x128xf32>
    %c6_24 = arith.constant 6 : index
    %54 = arith.index_cast %5 : i32 to index
    %c0_25 = arith.constant 0 : index
    %55 = vector.load %arg2[%c6_24, %54, %c0_25] : memref<14x8x128xf32, #tpu.memory_space<vmem>>, vector<1x8x128xf32>
    %56 = vector.shape_cast %55 : vector<1x8x128xf32> to vector<8x128xf32>
    %c7_26 = arith.constant 7 : index
    %57 = arith.index_cast %5 : i32 to index
    %c0_27 = arith.constant 0 : index
    %58 = vector.load %arg2[%c7_26, %57, %c0_27] : memref<14x8x128xf32, #tpu.memory_space<vmem>>, vector<1x8x128xf32>
    %59 = vector.shape_cast %58 : vector<1x8x128xf32> to vector<8x128xf32>
    %c8_28 = arith.constant 8 : index
    %60 = arith.index_cast %5 : i32 to index
    %c0_29 = arith.constant 0 : index
    %61 = vector.load %arg2[%c8_28, %60, %c0_29] : memref<14x8x128xf32, #tpu.memory_space<vmem>>, vector<1x8x128xf32>
    %62 = vector.shape_cast %61 : vector<1x8x128xf32> to vector<8x128xf32>
    %c9_30 = arith.constant 9 : index
    %63 = arith.index_cast %5 : i32 to index
    %c0_31 = arith.constant 0 : index
    %64 = vector.load %arg2[%c9_30, %63, %c0_31] : memref<14x8x128xf32, #tpu.memory_space<vmem>>, vector<1x8x128xf32>
    %65 = vector.shape_cast %64 : vector<1x8x128xf32> to vector<8x128xf32>
    %cst_32 = arith.constant 0.000000e+00 : f32
    %66 = vector.broadcast %cst_32 : f32 to vector<8x128xf32>
    %67 = arith.cmpf ogt, %50, %66 : vector<8x128xf32>
    %68 = arith.extui %67 : vector<8x128xi1> to vector<8x128xi32>
    %69 = arith.sitofp %68 : vector<8x128xi32> to vector<8x128xf32>
    %cst_33 = arith.constant 0.000000e+00 : f32
    %70 = vector.broadcast %cst_33 : f32 to vector<8x128xf32>
    %71 = arith.cmpf oeq, %50, %70 : vector<8x128xf32>
    %72 = arith.extui %71 : vector<8x128xi1> to vector<8x128xi32>
    %73 = arith.sitofp %72 : vector<8x128xi32> to vector<8x128xf32>
    %74 = arith.subf %20, %50 : vector<8x128xf32>
    %75 = arith.subf %35, %65 : vector<8x128xf32>
    %76 = arith.mulf %74, %74 : vector<8x128xf32>
    %77 = arith.mulf %75, %75 : vector<8x128xf32>
    %78 = arith.mulf %44, %44 : vector<8x128xf32>
    %79 = arith.mulf %47, %47 : vector<8x128xf32>
    %cst_34 = arith.constant 5.000000e-01 : f32
    %80 = vector.broadcast %cst_34 : f32 to vector<8x128xf32>
    %81 = arith.mulf %80, %78 : vector<8x128xf32>
    %82 = arith.subf %38, %81 : vector<8x128xf32>
    %cst_35 = arith.constant 5.000000e-01 : f32
    %83 = vector.broadcast %cst_35 : f32 to vector<8x128xf32>
    %84 = arith.mulf %83, %78 : vector<8x128xf32>
    %85 = arith.addf %38, %84 : vector<8x128xf32>
    %cst_36 = arith.constant 5.000000e-01 : f32
    %86 = vector.broadcast %cst_36 : f32 to vector<8x128xf32>
    %87 = arith.mulf %86, %79 : vector<8x128xf32>
    %88 = arith.subf %41, %87 : vector<8x128xf32>
    %cst_37 = arith.constant 5.000000e-01 : f32
    %89 = vector.broadcast %cst_37 : f32 to vector<8x128xf32>
    %90 = arith.mulf %89, %79 : vector<8x128xf32>
    %91 = arith.addf %41, %90 : vector<8x128xf32>
    %92 = arith.mulf %78, %79 : vector<8x128xf32>
    %93 = arith.mulf %14, %14 : vector<8x128xf32>
    %94 = arith.mulf %17, %17 : vector<8x128xf32>
    %cst_38 = arith.constant 5.000000e-01 : f32
    %95 = vector.broadcast %cst_38 : f32 to vector<8x128xf32>
    %96 = arith.mulf %95, %93 : vector<8x128xf32>
    %97 = arith.subf %8, %96 : vector<8x128xf32>
    %98 = arith.maximumf %97, %82 : vector<8x128xf32>
    %cst_39 = arith.constant 5.000000e-01 : f32
    %99 = vector.broadcast %cst_39 : f32 to vector<8x128xf32>
    %100 = arith.mulf %99, %93 : vector<8x128xf32>
    %101 = arith.addf %8, %100 : vector<8x128xf32>
    %102 = arith.minimumf %101, %85 : vector<8x128xf32>
    %cst_40 = arith.constant 5.000000e-01 : f32
    %103 = vector.broadcast %cst_40 : f32 to vector<8x128xf32>
    %104 = arith.mulf %103, %94 : vector<8x128xf32>
    %105 = arith.subf %11, %104 : vector<8x128xf32>
    %106 = arith.maximumf %105, %88 : vector<8x128xf32>
    %cst_41 = arith.constant 5.000000e-01 : f32
    %107 = vector.broadcast %cst_41 : f32 to vector<8x128xf32>
    %108 = arith.mulf %107, %94 : vector<8x128xf32>
    %109 = arith.addf %11, %108 : vector<8x128xf32>
    %110 = arith.minimumf %109, %91 : vector<8x128xf32>
    %111 = arith.subf %102, %98 : vector<8x128xf32>
    %cst_42 = arith.constant 0.000000e+00 : f32
    %112 = vector.broadcast %cst_42 : f32 to vector<8x128xf32>
    %113 = arith.maximumf %111, %112 : vector<8x128xf32>
    %114 = arith.subf %110, %106 : vector<8x128xf32>
    %cst_43 = arith.constant 0.000000e+00 : f32
    %115 = vector.broadcast %cst_43 : f32 to vector<8x128xf32>
    %116 = arith.maximumf %114, %115 : vector<8x128xf32>
    %117 = arith.mulf %113, %116 : vector<8x128xf32>
    %118 = arith.mulf %93, %94 : vector<8x128xf32>
    %119 = arith.addf %118, %92 : vector<8x128xf32>
    %120 = arith.subf %119, %117 : vector<8x128xf32>
    %cst_44 = arith.constant 1.000000e-10 : f32
    %121 = vector.broadcast %cst_44 : f32 to vector<8x128xf32>
    %122 = arith.maximumf %120, %121 : vector<8x128xf32>
    %123 = tpu.reciprocal %122 : vector<8x128xf32> -> vector<8x128xf32>
    %124 = arith.mulf %117, %123 : vector<8x128xf32>
    %125 = arith.mulf %29, %29 : vector<8x128xf32>
    %126 = arith.mulf %32, %32 : vector<8x128xf32>
    %cst_45 = arith.constant 5.000000e-01 : f32
    %127 = vector.broadcast %cst_45 : f32 to vector<8x128xf32>
    %128 = arith.mulf %127, %125 : vector<8x128xf32>
    %129 = arith.subf %23, %128 : vector<8x128xf32>
    %130 = arith.maximumf %129, %82 : vector<8x128xf32>
    %cst_46 = arith.constant 5.000000e-01 : f32
    %131 = vector.broadcast %cst_46 : f32 to vector<8x128xf32>
    %132 = arith.mulf %131, %125 : vector<8x128xf32>
    %133 = arith.addf %23, %132 : vector<8x128xf32>
    %134 = arith.minimumf %133, %85 : vector<8x128xf32>
    %cst_47 = arith.constant 5.000000e-01 : f32
    %135 = vector.broadcast %cst_47 : f32 to vector<8x128xf32>
    %136 = arith.mulf %135, %126 : vector<8x128xf32>
    %137 = arith.subf %26, %136 : vector<8x128xf32>
    %138 = arith.maximumf %137, %88 : vector<8x128xf32>
    %cst_48 = arith.constant 5.000000e-01 : f32
    %139 = vector.broadcast %cst_48 : f32 to vector<8x128xf32>
    %140 = arith.mulf %139, %126 : vector<8x128xf32>
    %141 = arith.addf %26, %140 : vector<8x128xf32>
    %142 = arith.minimumf %141, %91 : vector<8x128xf32>
    %143 = arith.subf %134, %130 : vector<8x128xf32>
    %cst_49 = arith.constant 0.000000e+00 : f32
    %144 = vector.broadcast %cst_49 : f32 to vector<8x128xf32>
    %145 = arith.maximumf %143, %144 : vector<8x128xf32>
    %146 = arith.subf %142, %138 : vector<8x128xf32>
    %cst_50 = arith.constant 0.000000e+00 : f32
    %147 = vector.broadcast %cst_50 : f32 to vector<8x128xf32>
    %148 = arith.maximumf %146, %147 : vector<8x128xf32>
    %149 = arith.mulf %145, %148 : vector<8x128xf32>
    %150 = arith.mulf %125, %126 : vector<8x128xf32>
    %151 = arith.addf %150, %92 : vector<8x128xf32>
    %152 = arith.subf %151, %149 : vector<8x128xf32>
    %cst_51 = arith.constant 1.000000e-10 : f32
    %153 = vector.broadcast %cst_51 : f32 to vector<8x128xf32>
    %154 = arith.maximumf %152, %153 : vector<8x128xf32>
    %155 = tpu.reciprocal %154 : vector<8x128xf32> -> vector<8x128xf32>
    %156 = arith.mulf %149, %155 : vector<8x128xf32>
    %157 = arith.cmpf oge, %124, %156 : vector<8x128xf32>
    %158 = arith.maximumf %124, %156 : vector<8x128xf32>
    %159 = arith.subf %20, %158 : vector<8x128xf32>
    %160 = arith.subf %35, %158 : vector<8x128xf32>
    %161 = arith.mulf %159, %159 : vector<8x128xf32>
    %162 = arith.mulf %160, %160 : vector<8x128xf32>
    %163 = arith.select %157, %161, %162 : vector<8x128xi1>, vector<8x128xf32>
    %164 = arith.subf %8, %38 : vector<8x128xf32>
    %165 = arith.mulf %164, %164 : vector<8x128xf32>
    %166 = arith.subf %11, %41 : vector<8x128xf32>
    %167 = arith.mulf %166, %166 : vector<8x128xf32>
    %168 = arith.addf %165, %167 : vector<8x128xf32>
    %169 = arith.subf %14, %44 : vector<8x128xf32>
    %170 = arith.mulf %169, %169 : vector<8x128xf32>
    %171 = arith.addf %168, %170 : vector<8x128xf32>
    %172 = arith.subf %17, %47 : vector<8x128xf32>
    %173 = arith.mulf %172, %172 : vector<8x128xf32>
    %174 = arith.addf %171, %173 : vector<8x128xf32>
    %175 = arith.subf %23, %53 : vector<8x128xf32>
    %176 = arith.mulf %175, %175 : vector<8x128xf32>
    %177 = arith.subf %26, %56 : vector<8x128xf32>
    %178 = arith.mulf %177, %177 : vector<8x128xf32>
    %179 = arith.addf %176, %178 : vector<8x128xf32>
    %180 = arith.subf %29, %59 : vector<8x128xf32>
    %181 = arith.mulf %180, %180 : vector<8x128xf32>
    %182 = arith.addf %179, %181 : vector<8x128xf32>
    %183 = arith.subf %32, %62 : vector<8x128xf32>
    %184 = arith.mulf %183, %183 : vector<8x128xf32>
    %185 = arith.addf %182, %184 : vector<8x128xf32>
    %186 = arith.select %157, %174, %185 : vector<8x128xi1>, vector<8x128xf32>
    %187 = arith.select %157, %77, %76 : vector<8x128xi1>, vector<8x128xf32>
    %c10 = arith.constant 10 : index
    %188 = arith.index_cast %5 : i32 to index
    %c0_52 = arith.constant 0 : index
    %189 = vector.load %arg1[%c10, %188, %c0_52] : memref<14x8x128xf32, #tpu.memory_space<vmem>>, vector<1x8x128xf32>
    %190 = vector.shape_cast %189 : vector<1x8x128xf32> to vector<8x128xf32>
    %c10_53 = arith.constant 10 : index
    %191 = arith.index_cast %5 : i32 to index
    %c0_54 = arith.constant 0 : index
    %192 = vector.load %arg2[%c10_53, %191, %c0_54] : memref<14x8x128xf32, #tpu.memory_space<vmem>>, vector<1x8x128xf32>
    %193 = vector.shape_cast %192 : vector<1x8x128xf32> to vector<8x128xf32>
    %194 = arith.subf %190, %193 : vector<8x128xf32>
    %195 = arith.mulf %194, %194 : vector<8x128xf32>
    %c11 = arith.constant 11 : index
    %196 = arith.index_cast %5 : i32 to index
    %c0_55 = arith.constant 0 : index
    %197 = vector.load %arg1[%c11, %196, %c0_55] : memref<14x8x128xf32, #tpu.memory_space<vmem>>, vector<1x8x128xf32>
    %198 = vector.shape_cast %197 : vector<1x8x128xf32> to vector<8x128xf32>
    %c11_56 = arith.constant 11 : index
    %199 = arith.index_cast %5 : i32 to index
    %c0_57 = arith.constant 0 : index
    %200 = vector.load %arg2[%c11_56, %199, %c0_57] : memref<14x8x128xf32, #tpu.memory_space<vmem>>, vector<1x8x128xf32>
    %201 = vector.shape_cast %200 : vector<1x8x128xf32> to vector<8x128xf32>
    %202 = arith.subf %198, %201 : vector<8x128xf32>
    %203 = arith.mulf %202, %202 : vector<8x128xf32>
    %204 = arith.addf %195, %203 : vector<8x128xf32>
    %c12 = arith.constant 12 : index
    %205 = arith.index_cast %5 : i32 to index
    %c0_58 = arith.constant 0 : index
    %206 = vector.load %arg1[%c12, %205, %c0_58] : memref<14x8x128xf32, #tpu.memory_space<vmem>>, vector<1x8x128xf32>
    %207 = vector.shape_cast %206 : vector<1x8x128xf32> to vector<8x128xf32>
    %c12_59 = arith.constant 12 : index
    %208 = arith.index_cast %5 : i32 to index
    %c0_60 = arith.constant 0 : index
    %209 = vector.load %arg2[%c12_59, %208, %c0_60] : memref<14x8x128xf32, #tpu.memory_space<vmem>>, vector<1x8x128xf32>
    %210 = vector.shape_cast %209 : vector<1x8x128xf32> to vector<8x128xf32>
    %211 = arith.subf %207, %210 : vector<8x128xf32>
    %212 = arith.mulf %211, %211 : vector<8x128xf32>
    %213 = arith.addf %204, %212 : vector<8x128xf32>
    %c13 = arith.constant 13 : index
    %214 = arith.index_cast %5 : i32 to index
    %c0_61 = arith.constant 0 : index
    %215 = vector.load %arg1[%c13, %214, %c0_61] : memref<14x8x128xf32, #tpu.memory_space<vmem>>, vector<1x8x128xf32>
    %216 = vector.shape_cast %215 : vector<1x8x128xf32> to vector<8x128xf32>
    %c13_62 = arith.constant 13 : index
    %217 = arith.index_cast %5 : i32 to index
    %c0_63 = arith.constant 0 : index
    %218 = vector.load %arg2[%c13_62, %217, %c0_63] : memref<14x8x128xf32, #tpu.memory_space<vmem>>, vector<1x8x128xf32>
    %219 = vector.shape_cast %218 : vector<1x8x128xf32> to vector<8x128xf32>
    %220 = arith.subf %216, %219 : vector<8x128xf32>
    %221 = arith.mulf %220, %220 : vector<8x128xf32>
    %222 = arith.addf %213, %221 : vector<8x128xf32>
    %cst_64 = arith.constant 1.000000e+00 : f32
    %223 = vector.broadcast %cst_64 : f32 to vector<8x128xf32>
    %224 = arith.mulf %223, %73 : vector<8x128xf32>
    %225 = arith.addf %76, %77 : vector<8x128xf32>
    %226 = arith.mulf %224, %225 : vector<8x128xf32>
    %cst_65 = arith.constant 8.000000e+00 : f32
    %227 = vector.broadcast %cst_65 : f32 to vector<8x128xf32>
    %228 = arith.mulf %227, %186 : vector<8x128xf32>
    %229 = arith.addf %163, %228 : vector<8x128xf32>
    %cst_66 = arith.constant 1.000000e+00 : f32
    %230 = vector.broadcast %cst_66 : f32 to vector<8x128xf32>
    %231 = arith.mulf %230, %187 : vector<8x128xf32>
    %232 = arith.addf %229, %231 : vector<8x128xf32>
    %cst_67 = arith.constant 0.699999988 : f32
    %233 = vector.broadcast %cst_67 : f32 to vector<8x128xf32>
    %234 = arith.mulf %233, %222 : vector<8x128xf32>
    %235 = arith.addf %232, %234 : vector<8x128xf32>
    %236 = arith.mulf %69, %235 : vector<8x128xf32>
    %237 = arith.addf %226, %236 : vector<8x128xf32>
    %238 = arith.addf %3, %237 : vector<8x128xf32>
    %c1_i32 = arith.constant 1 : i32
    %c0_68 = arith.constant 0 : index
    %c0_69 = arith.constant 0 : index
    %239 = vector.load %arg4[%c0_68, %c0_69] : memref<8x128xf32, #tpu.memory_space<vmem>>, vector<8x128xf32>
    %240 = arith.addf %239, %238 : vector<8x128xf32>
    %c0_70 = arith.constant 0 : index
    %c0_71 = arith.constant 0 : index
    %241 = vector.load %arg4[%c0_70, %c0_71] : memref<8x128xf32, #tpu.memory_space<vmem>>, vector<8x128xf32>
    tpu.vector_store %arg4[%c0_70, %c0_71], %240 {strides = array<i32>} : memref<8x128xf32, #tpu.memory_space<vmem>>, vector<8x128xf32>,
    %c0_i32_72 = arith.constant 0 : i32
    %242 = arith.cmpi eq, %arg0, %c0_i32_72 : i32
    %243 = arith.extui %242 : i1 to i32
    %c0_i32_73 = arith.constant 0 : i32
    %244 = arith.cmpi ne, %243, %c0_i32_73 : i32
    scf.if %244 {
      %c0_74 = arith.constant 0 : index
      %c0_75 = arith.constant 0 : index
      %245 = vector.load %arg4[%c0_74, %c0_75] : memref<8x128xf32, #tpu.memory_space<vmem>>, vector<8x128xf32>
      %246 = vector.shape_cast %245 : vector<8x128xf32> to vector<1x8x128xf32>
      %cst_76 = arith.constant dense<0.000000e+00> : vector<1xf32>
      %247 = vector.multi_reduction <add>, %246, %cst_76 [1, 2] : vector<1x8x128xf32> to vector<1xf32>
      %248 = vector.shape_cast %247 : vector<1xf32> to vector<1x1x1xf32>
      %249 = vector.extract %248[0, 0, 0] : f32 from vector<1x1x1xf32>
      %cst_77 = arith.constant 5.000000e-01 : f32
      %250 = arith.mulf %249, %cst_77 : f32
      %251 = vector.broadcast %250 : f32 to vector<1x1xf32>
      %c0_78 = arith.constant 0 : index
      %c0_79 = arith.constant 0 : index
      %252 = vector.load %arg3[%c0_78, %c0_79] : memref<1x1xf32, #tpu.memory_space<vmem>>, vector<1x1xf32>
      tpu.vector_store %arg3[%c0_78, %c0_79], %251 {strides = array<i32>} : memref<1x1xf32, #tpu.memory_space<vmem>>, vector<1x1xf32>,
    } else {
    }
    return
  }
  func.func @transform_0(%arg0: i32) -> (i32, i32, i32) {
    %c0_i32 = arith.constant 0 : i32
    %c0_i32_0 = arith.constant 0 : i32
    %c0_i32_1 = arith.constant 0 : i32
    return %c0_i32, %arg0, %c0_i32_0 : i32, i32, i32
  }
  func.func @transform_1(%arg0: i32) -> (i32, i32, i32) {
    %c0_i32 = arith.constant 0 : i32
    %c0_i32_0 = arith.constant 0 : i32
    %c0_i32_1 = arith.constant 0 : i32
    return %c0_i32, %arg0, %c0_i32_0 : i32, i32, i32
  }
  func.func @transform_2(%arg0: i32) -> (i32, i32) {
    %c0_i32 = arith.constant 0 : i32
    %c0_i32_0 = arith.constant 0 : i32
    %c0_i32_1 = arith.constant 0 : i32
    return %c0_i32, %c0_i32_0 : i32, i32
  }
}

</mosaic_0001>

<bundles_post_ra>
// kernel: tpu_custom_call.1
= control target key start
LH: loop header
LB: loop body
LE: loop exit
PB: predicated region body
PF: predicated region fallthrough
CT: control target
= control target key end

     0   :  { %7 = vsyncpa [#allocation4], 0  ;;  %s495_s0 = inlined_call_operand.hbm [shape: f32[14,8,128], index: 0, kind: input, shape index: {}]   ;;  %s496_s1 = inlined_call_operand.hbm [shape: f32[14,8,128], index: 1, kind: input, shape index: {}]   ;;  %s497_s2 = inlined_call_operand.hbm [shape: f32[1,1], index: 2, kind: output, shape index: {}]  }
   0x1   :  { %8 = vsyncpa [#allocation7], 0 }
   0x2   :  { %9 = vsyncpa [#allocation5], 0  ;;  %s14_s11 = sshll.u32 %s495_s0, 4  ;;  %s415_s12 = smov [#allocation3]   ;;  %s15_s11 = int_to_ptr.hbm [resolvable:$true] %s14_s11 }
   0x3   :  { %s16_s13 = sshll.u32 %s415_s12, 4  ;;  %s27_s16 = sshll.u32 %s496_s1, 4  ;;  %s17_s13 = int_to_ptr.vmem [resolvable:$true] %s16_s13  ;;  %s28_s16 = int_to_ptr.hbm [resolvable:$true] %s27_s16 }
   0x4   :  { %s416_s17 = smov 128   ;;  %s417_s18 = smov 8  }
   0x5   :  { %22 = dma.hbm_to_vmem [thread:$0]  %s15_s11, 1792, %s17_s13, [#allocation4], %s416_s17, %s416_s17, %s417_s18  }
   0x6   :  { %s418_s19 = smov [#allocation6]  }
   0x7   :  { %s29_s20 = sshll.u32 %s418_s19, 4  ;;  %s30_s20 = int_to_ptr.vmem [resolvable:$true] %s29_s20 }
   0x8   :  { %35 = dma.hbm_to_vmem [thread:$0]  %s28_s16, 1792, %s30_s20, [#allocation7], %s416_s17, %s416_s17, %s417_s18  }
   0x9   :  { %409 = dma.done.wait [#allocation4], 1792  }
   0xa   :  { %410 = vsyncadd [#allocation4], 4294965504 }
   0xb   :  { %411 = dma.done.wait [#allocation7], 1792  }
   0xc   :  { %412 = vsyncadd [#allocation7], 4294965504  ;;  %v442_v0 = vld [vmem:[#allocation3 + $0x10] sm:$0xff]  ;;  %v444_v1 = vld [vmem:[#allocation3 + $0x18] sm:$0xff]  ;;  %s420_s0 = smov [#allocation8]   ;;  %s286_s23 = sshll.u32 %s497_s2, 4  ;;  %s287_s23 = int_to_ptr.hbm [resolvable:$true] %s286_s23 }
   0xd   :  { %v115_v2 = vmul.f32 %v442_v0, %v442_v0  ;;  %v448_v3 = vld [vmem:[#allocation3 + $0x38] sm:$0xff]  ;;  %v116_v4 = vmul.f32 %v444_v1, %v444_v1  ;;  %v452_v5 = vld [vmem:[#allocation3 + $0x40] sm:$0xff]  ;;  %v456_v9 = vld [vmem:[#allocation6 + $0x18] sm:$0xff]  ;;  %s284_s1 = sshll.u32 %s420_s0, 4  ;;  %vm277_vm11 = vcmask 0   ;;  %s285_s1 = int_to_ptr.vmem [resolvable:$true] %s284_s1 }
   0xe   :  { %v49_v7 = vld [vmem:[#allocation3] sm:$0xff]  ;;  %v52_v11 = vld [vmem:[#allocation3 + $0x8] sm:$0xff]  ;;  %v151_v13 = vmul.f32 %v448_v3, %v448_v3  ;;  %v77_v14 = vld [vmem:[#allocation6] sm:$0xff]  ;;  %v107_v15 = vmul.f32 %v456_v9, %v456_v9  ;;  %v152_v16 = vmul.f32 %v452_v5, %v452_v5 }
   0xf   :  { %v117_v6 = vmul.f32 0.5, %v115_v2  ;;  %v454_v8 = vld [vmem:[#allocation6 + $0x10] sm:$0xff]  ;;  %v122_v10 = vmul.f32 0.5, %v116_v4  ;;  %v79_v17 = vld [vmem:[#allocation6 + $0x8] sm:$0xff]  ;;  %v64_v21 = vld [vmem:[#allocation3 + $0x28] sm:$0xff]  ;;  %v132_v28 = vmul.f32 %v116_v4, %v115_v2  ;;  %v194_v2 = vsub.f32 %v49_v7, %v77_v14 }
  0x10   :  { %v106_v12 = vmul.f32 %v454_v8, %v454_v8  ;;  %v111_v22 = vmul.f32 0.5, %v107_v15  ;;  %v67_v25 = vld [vmem:[#allocation3 + $0x30] sm:$0xff]  ;;  %v153_v29 = vmul.f32 0.5, %v151_v13  ;;  %v158_v33 = vmul.f32 0.5, %v152_v16  ;;  %v87_v62 = vld [vmem:[#allocation6 + $0x28] sm:$0xff]  ;;  %v89_v63 = vld [vmem:[#allocation6 + $0x30] sm:$0xff] }
  0x11   :  { %v118_v19 = vsub.f32 %v49_v7, %v117_v6  ;;  %v120_v20 = vadd.f32 %v117_v6, %v49_v7  ;;  %v123_v23 = vsub.f32 %v52_v11, %v122_v10  ;;  %v125_v24 = vadd.f32 %v122_v10, %v52_v11 }
  0x12   :  { %v108_v18 = vmul.f32 0.5, %v106_v12  ;;  %v112_v30 = vsub.f32 %v79_v17, %v111_v22  ;;  %v113_v31 = vadd.f32 %v111_v22, %v79_v17  ;;  %v114_v32 = vmul.f32 %v107_v15, %v106_v12  ;;  %v227_v22 = vld [vmem:[#allocation3 + $0x58] sm:$0xff] }
  0x13   :  { %v154_v36 = vsub.f32 %v64_v21, %v153_v29  ;;  %v156_v37 = vadd.f32 %v153_v29, %v64_v21  ;;  %v159_v40 = vsub.f32 %v67_v25, %v158_v33  ;;  %v161_v41 = vadd.f32 %v158_v33, %v67_v25 }
  0x14   :  { %v109_v26 = vsub.f32 %v77_v14, %v108_v18  ;;  %v110_v27 = vadd.f32 %v108_v18, %v77_v14  ;;  %v124_v38 = vmax.f32 %v123_v23, %v112_v30  ;;  %v126_v39 = vmin.f32 %v125_v24, %v113_v31  ;;  %v229_v23 = vld [vmem:[#allocation6 + $0x58] sm:$0xff] }
  0x15   :  { %v160_v46 = vmax.f32 %v159_v40, %v112_v30  ;;  %v162_v47 = vmin.f32 %v161_v41, %v113_v31  ;;  %v168_v48 = vmul.f32 %v152_v16, %v151_v13  ;;  %v133_v52 = vadd.f32 %v132_v28, %v114_v32  ;;  %v91_v13 = vld [vmem:[#allocation6 + $0x38] sm:$0xff] }
  0x16   :  { %v119_v34 = vmax.f32 %v118_v19, %v109_v26  ;;  %v121_v35 = vmin.f32 %v120_v20, %v110_v27  ;;  %v155_v43 = vmax.f32 %v154_v36, %v109_v26  ;;  %v157_v44 = vmin.f32 %v156_v37, %v110_v27  ;;  %v220_v19 = vld [vmem:[#allocation3 + $0x50] sm:$0xff]  ;;  %v222_v20 = vld [vmem:[#allocation6 + $0x50] sm:$0xff] }
  0x17   :  { %v129_v45 = vsub.f32 %v126_v39, %v124_v38  ;;  %v165_v53 = vsub.f32 %v162_v47, %v160_v46  ;;  %v169_v57 = vadd.f32 %v168_v48, %v114_v32  ;;  %v196_v4 = vsub.f32 %v52_v11, %v79_v17  ;;  %v93_v11 = vld [vmem:[#allocation6 + $0x40] sm:$0xff]  ;;  %v243_v47 = vld [vmem:[#allocation3 + $0x68] sm:$0xff]  ;;  %v245_v48 = vld [vmem:[#allocation6 + $0x68] sm:$0xff] }
  0x18   :  { %v127_v42 = vsub.f32 %v121_v35, %v119_v34  ;;  %v163_v50 = vsub.f32 %v157_v44, %v155_v43  ;;  %v205_v10 = vsub.f32 %v64_v21, %v87_v62  ;;  %v207_v12 = vsub.f32 %v67_v25, %v89_v63  ;;  %v235_v35 = vld [vmem:[#allocation3 + $0x60] sm:$0xff]  ;;  %v237_v36 = vld [vmem:[#allocation6 + $0x60] sm:$0xff] }
  0x19   :  { %v130_v51 = vmax.f32 %v129_v45, 0.0  ;;  %v166_v56 = vmax.f32 %v165_v53, 0.0  ;;  %v195_v15 = vmul.f32 %v194_v2, %v194_v2  ;;  %v197_v16 = vmul.f32 %v196_v4, %v196_v4  ;;  %v61_v4 = vld [vmem:[#allocation3 + $0x20] sm:$0xff] }
  0x1a   :  { %v128_v49 = vmax.f32 %v127_v42, 0.0  ;;  %v164_v54 = vmax.f32 %v163_v50, 0.0  ;;  %v199_v18 = vsub.f32 %v442_v0, %v454_v8  ;;  %v206_v26 = vmul.f32 %v205_v10, %v205_v10 }
  0x1b   :  { %v208_v27 = vmul.f32 %v207_v12, %v207_v12  ;;  %v210_v7 = vsub.f32 %v448_v3, %v91_v13  ;;  %v223_v21 = vsub.f32 %v220_v19, %v222_v20  ;;  %v198_v25 = vadd.f32 %v197_v16, %v195_v15 }
  0x1c   :  { %v466_v55 = vmul.f32 %v130_v51, %v128_v49  ;;  %v469_v59 = vmul.f32 %v166_v56, %v164_v54  ;;  %v200_v28 = vmul.f32 %v199_v18, %v199_v18  ;;  %v202_v29 = vsub.f32 %v444_v1, %v456_v9 }
  0x1d   :  { %v230_v30 = vsub.f32 %v227_v22, %v229_v23  ;;  %v209_v33 = vadd.f32 %v208_v27, %v206_v26  ;;  %v211_v34 = vmul.f32 %v210_v7, %v210_v7  ;;  %v213_v3 = vsub.f32 %v452_v5, %v93_v11 }
  0x1e   :  { %v134_v58 = vsub.f32 %v133_v52, %v466_v55  ;;  %v170_v61 = vsub.f32 %v169_v57, %v469_v59  ;;  %v224_v40 = vmul.f32 %v223_v21, %v223_v21  ;;  %v238_v44 = vsub.f32 %v235_v35, %v237_v36  ;;  %v85_v57 = vld [vmem:[#allocation6 + $0x20] sm:$0xff] }
  0x1f   :  { %v231_v43 = vmul.f32 %v230_v30, %v230_v30  ;;  %v201_v5 = vadd.f32 %v200_v28, %v198_v25  ;;  %v203_v46 = vmul.f32 %v202_v29, %v202_v29  ;;  %v212_v52 = vadd.f32 %v211_v34, %v209_v33 }
  0x20   :  { %v135_v60 = vmax.f32 %v134_v58, 1e-10  ;;  %v171_v6 = vmax.f32 %v170_v61, 1e-10  ;;  %v214_v53 = vmul.f32 %v213_v3, %v213_v3  ;;  %v95_v58 = vld [vmem:[#allocation6 + $0x48] sm:$0xff]  ;;  %v239_v61 = vmul.f32 %v238_v44, %v238_v44 }
  0x21   :  { %v246_v62 = vsub.f32 %v243_v47, %v245_v48  ;;  %v204_v12 = vadd.f32 %v203_v46, %v201_v5  ;;  %v102_v15 = vsub.f32 %v61_v4, %v85_v57  ;;  %vm99_vm9 = vcmp.eq.f32.partialorder %v85_v57, 0.0 }
  0x22   :  { %333 = vrcp.f32 %v135_v60  ;;  %v147_v17 = vand.u32 2147483648, %v135_v60  ;;  %vm141_vm0 = vweird.f32 %v135_v60  ;;  %v145_v31 = vand.u32 2147483647, %v135_v60 }
  0x23   :  { %335 = vrcp.f32 %v171_v6  ;;  %v183_v39 = vand.u32 2147483648, %v171_v6  ;;  %vm177_vm3 = vweird.f32 %v171_v6  ;;  %v181_v9 = vand.u32 2147483647, %v171_v6 }
  0x24   :  { %v148_v38 = vor.u32 1.1754944e-38, %v147_v17  ;;  %vm146_vm5 = vcmp.eq.f32.partialorder %v145_v31, 8.507059e+37  ;;  %v215_v13 = vadd.f32 %v214_v53, %v212_v52  ;;  %v247_v20 = vmul.f32 %v246_v62, %v246_v62 }
  0x25   :  { %v184_v51 = vor.u32 1.1754944e-38, %v183_v39  ;;  %vm182_vm7 = vcmp.eq.f32.partialorder %v181_v9, 8.507059e+37  ;;  %vm96_vm10 = vcmp.gt.f32.partialorder %v85_v57, 0.0  ;;  %v419_v30 = vmov 0.0  }
  0x26   :  { %v323_v31 = vsel %vm96_vm10, 1.0, %v419_v30 }
  0x28   :  { %v334_v24 = vpop.eup %333 }
  0x29   :  { %v137_v14 = vmul.f32 %v334_v24, %v135_v60  ;;  %v336_v0 = vpop.eup %335  ;;  %vm142_vm1 = vweird.f32 %v334_v24  ;;  %v232_v60 = vadd.f32 %v231_v43, %v224_v40 }
  0x2a   :  { %v173_v32 = vmul.f32 %v336_v0, %v171_v6  ;;  %vm478_vm2 = vmor %vm141_vm0, %vm142_vm1  ;;  %vm178_vm4 = vweird.f32 %v336_v0  ;;  %v76_v6 = vld [vmem:[#allocation3 + $0x48] sm:$0xff] }
  0x2b   :  { %v138_v8 = vsub.f32 1.0, %v137_v14  ;;  %vm484_vm6 = vmor %vm177_vm3, %vm178_vm4  ;;  %v103_v16 = vsub.f32 %v76_v6, %v95_v58  ;;  %v240_v19 = vadd.f32 %v239_v61, %v232_v60 }
  0x2c   :  { %v174_v1 = vsub.f32 1.0, %v173_v32 }
  0x2d   :  { %v139_v37 = vmul.f32 %v334_v24, %v138_v8  ;;  %v105_v26 = vmul.f32 %v103_v16, %v103_v16  ;;  %v248_v7 = vadd.f32 %v247_v20, %v240_v19 }
  0x2e   :  { %v175_v45 = vmul.f32 %v336_v0, %v174_v1 }
  0x2f   :  { %v140_v42 = vadd.f32 %v334_v24, %v139_v37 }
  0x30   :  { %v176_v56 = vadd.f32 %v336_v0, %v175_v45 }
  0x31   :  { %v144_v49 = vsel %vm478_vm2, %v334_v24, %v140_v42  ;;  %v104_v24 = vmul.f32 %v102_v15, %v102_v15 }
  0x32   :  { %v149_v54 = vsel %vm146_vm5, %v148_v38, %v144_v49  ;;  %v180_v2 = vsel %vm484_vm6, %v336_v0, %v176_v56  ;;  %v324_v0 = vsel %vm99_vm9, 1.0, %v419_v30 }
  0x33   :  { %v150_v63 = vmul.f32 %v149_v54, %v466_v55  ;;  %v185_v10 = vsel %vm182_vm7, %v184_v51, %v180_v2  ;;  %v249_v28 = vadd.f32 %v105_v26, %v104_v24 }
  0x34   :  { %v186_v18 = vmul.f32 %v185_v10, %v469_v59  ;;  %v254_v59 = vmul.f32 0.7, %v248_v7 }
  0x35   :  { %v250_v32 = vmul.f32 %v324_v0, %v249_v28 }
  0x36   :  { %vm187_vm8 = vcmp.ge.f32.partialorder %v150_v63, %v186_v18  ;;  %v188_v22 = vmax.f32 %v150_v63, %v186_v18 }
  0x37   :  { %v216_v23 = vsel %vm187_vm8, %v204_v12, %v215_v13  ;;  %v217_v25 = vsel %vm187_vm8, %v105_v26, %v104_v24 }
  0x38   :  { %v189_v55 = vsub.f32 %v61_v4, %v188_v22  ;;  %v190_v27 = vsub.f32 %v76_v6, %v188_v22  ;;  %v251_v11 = vmul.f32 8.0, %v216_v23 }
  0x3a   :  { %v191_v14 = vmul.f32 %v189_v55, %v189_v55  ;;  %v192_v17 = vmul.f32 %v190_v27, %v190_v27 }
  0x3c   :  { %v193_v21 = vsel %vm187_vm8, %v191_v14, %v192_v17 }
  0x3d   :  { %v252_v29 = vadd.f32 %v251_v11, %v193_v21 }
  0x3f   :  { %v253_v8 = vadd.f32 %v252_v29, %v217_v25 }
  0x41   :  { %v255_v33 = vadd.f32 %v254_v59, %v253_v8 }
  0x43   :  { %v256_v34 = vmul.f32 %v323_v31, %v255_v33 }
  0x45   :  { %v257_v3 = vadd.f32 %v256_v34, %v250_v32 }
  0x47   :  { %266 = vadd.xlane.f32.xlu0 %v257_v3 }
  0xba   :  { %v267_v35 = vpop.xlane.xlu0 %266 }
  0xbb   :  { %v268_v36 = vrot.slane %v267_v35, 4 }
  0xbd   :  { %v269_v37 = vadd.f32 %v268_v36, %v267_v35 }
  0xbf   :  { %v270_v38 = vrot.slane %v269_v37, 2 }
  0xc1   :  { %v271_v39 = vadd.f32 %v270_v38, %v269_v37 }
  0xc3   :  { %v272_v40 = vrot.slane %v271_v39, 1 }
  0xc5   :  { %v273_v41 = vadd.f32 %v272_v40, %v271_v39 }
  0xc7   :  { %325 = vpush %v273_v41 }
  0xf8   :  { %s326_s24 = spop %325 }
  0xf9   :  { %s275_s25 = smul.f32 0.5, %s326_s24 }
  0xfb   :  { %v276_v1 = vstv %s275_s25 }
  0xfc   :  { %278 = vst.msk [vmem:[#allocation8] sm:$0x1] %vm277_vm11, %v276_v1 }
  0xfd   :  { %289 = dma.vmem_to_hbm [thread:$0]  %s285_s1, 16, %s287_s23, [#allocation5]  }
  0xfe   :  { %413 = dma.done.wait [#allocation5], 16  }
  0xff   :  { %414 = vsyncadd [#allocation5], 4294967280 }
 0x100   :  { %294 = vsyncpa [#allocation4], 1 }
 0x101   :  { %295 = vsyncpa [#allocation7], 1 }
 0x102   :  { %296 = vsyncpa [#allocation5], 1 }

</bundles_post_ra>
